<compile_context>
chip_gen: v6e
topology: v6e:2x2x1
jax: 0.10.0
libtpu: 0.0.40
codegen_flags: <defaults>
</compile_context>

<pallas_src>
import functools
import math
from typing import List, Tuple

import jax
import jax.numpy as jnp
from jax.experimental import pallas as pl
from jax.experimental.pallas import tpu as pltpu

_LANE = 128
_SUBLANE = 8


def _round_up(n: int, m: int) -> int:
    return ((n + m - 1) // m) * m


def _device_kind() -> str:
    try:
        return jax.devices()[0].device_kind.lower()
    except Exception:
        return ""


def _default_block_m() -> int:
    # v5e's MXU is 128x128: M=256 buys nothing but doubles the live activation
    # tile; keep 256 on v6e/v7x (256-wide MXU).
    return 128 if "v5" in _device_kind() else 256


def _physical_vmem_bytes() -> int:
    kind = _device_kind()
    if ("v5" in kind) or ("v6" in kind):
        return 128 * 1024 * 1024
    # v7x (and unknown): 64 MiB per TensorCore -- be conservative.
    return 64 * 1024 * 1024


def _make_fused_mlp_kernel(num_layers: int, compute_dtype):
    """Kernel over refs: (x, w0, b0, w1, b1, ..., w_{L-1}, b_{L-1}, out)."""

    def kernel(*refs):
        x_ref = refs[0]
        o_ref = refs[-1]
        # Intermediate activations live entirely on-chip (values -> vregs/VMEM);
        # only the final layer result is written back to HBM.
        h = x_ref[...]  # already compute_dtype for layer 0 (no extra cast)
        for li in range(num_layers):
            w_ref = refs[1 + 2 * li]
            b_ref = refs[2 + 2 * li]
            y = jnp.dot(
                h.astype(compute_dtype),
                w_ref[...],
                preferred_element_type=jnp.float32,  # MXU accumulates in f32
            )
            # Bias add + ReLU in f32 (v5e has no bf16 VPU path).
            h = jnp.maximum(y + b_ref[...], 0.0)
        o_ref[...] = h.astype(o_ref.dtype)

    return kernel


def prepare_params(
    params: List[Tuple[jax.Array, jax.Array]],
    compute_dtype=jnp.bfloat16,
) -> List[Tuple[jax.Array, jax.Array]]:
    """Pad feature dims to multiples of 128 and cast weights to compute_dtype.

    Call this ONCE (at init / weight-update time), not per forward step:
    the padding ops re-read every weight and would otherwise dominate the
    per-call cost for weight-heavy MLPs.
    """
    prepared = []
    for w, b in params:
        din, dout = w.shape
        din_p, dout_p = _round_up(din, _LANE), _round_up(dout, _LANE)
        w_p = (
            jnp.zeros((din_p, dout_p), compute_dtype)
            .at[:din, :dout]
            .set(w.astype(compute_dtype))
        )
        b_p = (
            jnp.zeros((1, dout_p), jnp.float32)
            .at[:, :dout]
            .set(b.reshape(1, dout).astype(jnp.float32))
        )
        prepared.append((w_p, b_p))
    return prepared


@functools.partial(
    jax.jit, static_argnames=("d_out", "compute_dtype", "out_dtype", "block_m")
)
def feedforward_controller_forward(
    x: jax.Array,
    prepared: List[Tuple[jax.Array, jax.Array]],
    *,
    d_out: int,
    compute_dtype=jnp.bfloat16,
    out_dtype=jnp.float32,
    block_m: int = None,
) -> jax.Array:
    """Forward pass of FeedforwardController (sequential Linear->ReLU layers)
    fused into a single Pallas call.

    x: (B, Din).  prepared: output of `prepare_params` (padded, compute_dtype
    weights; padded f32 biases).  d_out: logical (unpadded) output width.
    """
    num_layers = len(prepared)
    if num_layers == 0:
        return x

    B, Din = x.shape
    din_p0 = prepared[0][0].shape[0]
    dout_p_last = prepared[-1][0].shape[1]
    assert Din <= din_p0

    if block_m is None:
        block_m = _default_block_m()
    assert block_m % _SUBLANE == 0

    # --- batch tiling ----------------------------------------------------
    b8 = _round_up(max(B, _SUBLANE), _SUBLANE)
    if b8 <= _SUBLANE:
        tm = _SUBLANE
    else:
        # At least 2 grid steps (feeds both v7x TensorCores via the "parallel"
        # axis) while keeping the batch over-padding to <= one sublane group.
        tm = min(block_m, _round_up(pl.cdiv(b8, 2), _SUBLANE))
    b_pad = _round_up(b8, tm)
    grid_m = b_pad // tm

    # Zero-pad input directly in compute_dtype (halves input DMA for bf16 and
    # removes the per-tile cast on layer 0). Padded rows/cols are zeros and
    # padded weight rows are zeros, so real output lanes are unaffected.
    x_pad = (
        jnp.zeros((b_pad, din_p0), compute_dtype)
        .at[:B, :Din]
        .set(x.astype(compute_dtype))
    )

    inputs = [x_pad]
    in_specs = [pl.BlockSpec((tm, din_p0), lambda i: (i, 0))]
    for w_p, b_p in prepared:
        inputs += [w_p, b_p]
        # Constant index_map: weights/biases stay VMEM-resident across all
        # batch-grid blocks. Buffered(1): double-buffering a constant block
        # buys nothing and would double its VMEM footprint.
        in_specs += [
            pl.BlockSpec(w_p.shape, lambda i: (0, 0), pipeline_mode=pl.Buffered(1)),
            pl.BlockSpec(b_p.shape, lambda i: (0, 0), pipeline_mode=pl.Buffered(1)),
        ]

    # --- explicit VMEM budget --------------------------------------------
    bytes_cd = jnp.dtype(compute_dtype).itemsize
    bytes_out = jnp.dtype(out_dtype).itemsize
    max_dim_p = max([din_p0] + [w.shape[1] for w, _ in prepared])
    w_bytes = sum(w.shape[0] * w.shape[1] * bytes_cd for w, _ in prepared)  # Buffered(1)
    b_bytes = sum(_SUBLANE * b.shape[1] * 4 for _, b in prepared)           # sublane-padded
    x_bytes = 2 * tm * din_p0 * bytes_cd                                    # double-buffered in tile
    o_bytes = 2 * tm * dout_p_last * bytes_out                              # double-buffered out tile
    act_bytes = 2 * tm * max_dim_p * 4                                      # live f32 intermediates
    footprint = w_bytes + b_bytes + x_bytes + o_bytes + act_bytes
    vmem_limit = int(
        min(max(footprint * 1.3, 32 * 1024 * 1024), 0.9 * _physical_vmem_bytes())
    )
    # TODO(synk): if any single padded weight exceeds ~1/3 of the VMEM budget
    # (possible on v7x's 64 MiB for very wide layers), that layer should be
    # streamed from HBM (memory_space=pl.ANY + pltpu.emit_pipeline over K)
    # instead of being held VMEM-resident.

    out_pad = pl.pallas_call(
        _make_fused_mlp_kernel(num_layers, compute_dtype),
        out_shape=jax.ShapeDtypeStruct((b_pad, dout_p_last), out_dtype),
        grid=(grid_m,),
        in_specs=in_specs,
        out_specs=pl.BlockSpec((tm, dout_p_last), lambda i: (i, 0)),
        compiler_params=pltpu.CompilerParams(
            # Batch axis is independent -> shard across v7x's 2 TensorCores.
            dimension_semantics=("parallel",),
            vmem_limit_bytes=vmem_limit,
        ),
    )(*inputs)

    # Skip the column slice when the logical output width is already lane-dense.
    if d_out == dout_p_last:
        return out_pad if b_pad == B else out_pad[:B]
    return out_pad[:B, :d_out]


def feedforward_controller_ref(
    x: jax.Array,
    params: List[Tuple[jax.Array, jax.Array]],
    compute_dtype=jnp.float32,
) -> jax.Array:
    """Pure-JAX reference with the same dtype policy as the kernel."""
    h = x.astype(compute_dtype)
    for w, b in params:
        y = jnp.dot(
            h.astype(compute_dtype),
            w.astype(compute_dtype),
            preferred_element_type=jnp.float32,
        )
        h = jnp.maximum(y + b.astype(jnp.float32), 0.0)
    return h


def init_feedforward_params(
    key: jax.Array, input_size: int, layer_sizes: List[int]
) -> List[Tuple[jax.Array, jax.Array]]:
    """Deterministic parameter init mirroring the PyTorch module's Linear shapes.

    Weights: Kaiming-uniform style, bound = gain * sqrt(3 / fan_in) with
    gain = calculate_gain('relu') = sqrt(2).
    Biases: uniform(-1/sqrt(fan_in), 1/sqrt(fan_in)).
    # TODO(synk): linear_reset() source not provided in the spec; bias bound
    # assumed to follow PyTorch's default Linear reset.
    """
    gain = math.sqrt(2.0)
    params = []
    in_sizes = [input_size] + layer_sizes[:-1]
    for fan_in, fan_out in zip(in_sizes, layer_sizes):
        key, kw, kb = jax.random.split(key, 3)
        w_bound = gain * math.sqrt(3.0 / fan_in)
        b_bound = 1.0 / math.sqrt(fan_in)
        w = jax.random.uniform(
            kw, (fan_in, fan_out), minval=-w_bound, maxval=w_bound, dtype=jnp.float32
        )
        b = jax.random.uniform(
            kb, (1, fan_out), minval=-b_bound, maxval=b_bound, dtype=jnp.float32
        )
        params.append((w, b))
    return params


if __name__ == "__main__":
    key = jax.random.PRNGKey(0)

    batch = 2
    input_size = 32
    layer_sizes = [64, 32]  # two Linear+ReLU layers
    d_out = layer_sizes[-1]

    key, kx = jax.random.split(key)
    x = jax.random.normal(kx, (batch, input_size), dtype=jnp.float32)
    params = init_feedforward_params(key, input_size, layer_sizes)

    # bf16-weight default path (f32 accumulation): loose tolerance vs bf16 ref.
    prepared_bf16 = prepare_params(params, compute_dtype=jnp.bfloat16)
    out_bf16 = feedforward_controller_forward(
        x, prepared_bf16, d_out=d_out, compute_dtype=jnp.bfloat16
    )
    out_bf16 = jax.block_until_ready(out_bf16)
    ref_bf16 = feedforward_controller_ref(x, params, compute_dtype=jnp.bfloat16)
    assert out_bf16.shape == (batch, d_out)
    assert jnp.allclose(out_bf16, ref_bf16, atol=2e-2, rtol=2e-2), "bf16 mismatch"

    # f32 path: exact match against the reference.
    prepared_f32 = prepare_params(params, compute_dtype=jnp.float32)
    out_f32 = feedforward_controller_forward(
        x, prepared_f32, d_out=d_out, compute_dtype=jnp.float32
    )
    out_f32 = jax.block_until_ready(out_f32)
    ref_f32 = feedforward_controller_ref(x, params, compute_dtype=jnp.float32)
    assert out_f32.shape == (batch, d_out)
    assert jnp.allclose(out_f32, ref_f32, atol=1e-5, rtol=1e-5), "f32 mismatch"

    print("KERNEL_OK")
</pallas_src>

<mosaic_0001>
module attributes {stable_mosaic.version = 11 : i64} {
  func.func @kernel(%arg0: i32, %arg1: memref<8x128xbf16, #tpu.memory_space<vmem>>, %arg2: memref<128x128xbf16, #tpu.memory_space<vmem>>, %arg3: memref<1x128xf32, #tpu.memory_space<vmem>>, %arg4: memref<128x128xbf16, #tpu.memory_space<vmem>>, %arg5: memref<1x128xf32, #tpu.memory_space<vmem>>, %arg6: memref<8x128xf32, #tpu.memory_space<vmem>>) attributes {dimension_semantics = [#tpu.dimension_semantics<parallel>], iteration_bounds = array<i64: 1>, scalar_prefetch = 0 : i64, scratch_operands = 0 : i64, tpu.core_type = #tpu.core_type<tc>, window_params = [{transform_indices = @transform_0, window_bounds = array<i64: 8, 128>}, {pipeline_mode = #tpu.pipeline_mode<synchronous>, transform_indices = @transform_1, window_bounds = array<i64: 128, 128>}, {pipeline_mode = #tpu.pipeline_mode<synchronous>, transform_indices = @transform_2, window_bounds = array<i64: 1, 128>}, {pipeline_mode = #tpu.pipeline_mode<synchronous>, transform_indices = @transform_3, window_bounds = array<i64: 128, 128>}, {pipeline_mode = #tpu.pipeline_mode<synchronous>, transform_indices = @transform_4, window_bounds = array<i64: 1, 128>}, {transform_indices = @transform_5, window_bounds = array<i64: 8, 128>}]} {
    %c0 = arith.constant 0 : index
    %c0_0 = arith.constant 0 : index
    %0 = vector.load %arg1[%c0, %c0_0] : memref<8x128xbf16, #tpu.memory_space<vmem>>, vector<8x128xbf16>
    %c0_1 = arith.constant 0 : index
    %c0_2 = arith.constant 0 : index
    %1 = vector.load %arg2[%c0_1, %c0_2] : memref<128x128xbf16, #tpu.memory_space<vmem>>, vector<128x128xbf16>
    %cst = arith.constant dense<0.000000e+00> : vector<8x128xf32>
    %2 = tpu.matmul %0, %1, %cst {dimension_numbers = #tpu.dot_dimension_numbers<[1], [0], [0], [1], [0, 0, 1, 1], [], []>} : vector<8x128xbf16>, vector<128x128xbf16>, vector<8x128xf32> -> vector<8x128xf32>
    %c0_3 = arith.constant 0 : index
    %c0_4 = arith.constant 0 : index
    %3 = vector.load %arg3[%c0_3, %c0_4] : memref<1x128xf32, #tpu.memory_space<vmem>>, vector<1x128xf32>
    %4 = vector.broadcast %3 : vector<1x128xf32> to vector<8x128xf32>
    %5 = arith.addf %2, %4 : vector<8x128xf32>
    %cst_5 = arith.constant 0.000000e+00 : f32
    %6 = vector.broadcast %cst_5 : f32 to vector<8x128xf32>
    %7 = arith.maximumf %5, %6 : vector<8x128xf32>
    %8 = arith.truncf %7 : vector<8x128xf32> to vector<8x128xbf16>
    %c0_6 = arith.constant 0 : index
    %c0_7 = arith.constant 0 : index
    %9 = vector.load %arg4[%c0_6, %c0_7] : memref<128x128xbf16, #tpu.memory_space<vmem>>, vector<128x128xbf16>
    %cst_8 = arith.constant dense<0.000000e+00> : vector<8x128xf32>
    %10 = tpu.matmul %8, %9, %cst_8 {dimension_numbers = #tpu.dot_dimension_numbers<[1], [0], [0], [1], [0, 0, 1, 1], [], []>} : vector<8x128xbf16>, vector<128x128xbf16>, vector<8x128xf32> -> vector<8x128xf32>
    %c0_9 = arith.constant 0 : index
    %c0_10 = arith.constant 0 : index
    %11 = vector.load %arg5[%c0_9, %c0_10] : memref<1x128xf32, #tpu.memory_space<vmem>>, vector<1x128xf32>
    %12 = vector.broadcast %11 : vector<1x128xf32> to vector<8x128xf32>
    %13 = arith.addf %10, %12 : vector<8x128xf32>
    %cst_11 = arith.constant 0.000000e+00 : f32
    %14 = vector.broadcast %cst_11 : f32 to vector<8x128xf32>
    %15 = arith.maximumf %13, %14 : vector<8x128xf32>
    %c0_12 = arith.constant 0 : index
    %c0_13 = arith.constant 0 : index
    %16 = vector.load %arg6[%c0_12, %c0_13] : memref<8x128xf32, #tpu.memory_space<vmem>>, vector<8x128xf32>
    tpu.vector_store %arg6[%c0_12, %c0_13], %15 {strides = array<i32>} : memref<8x128xf32, #tpu.memory_space<vmem>>, vector<8x128xf32>,
    return
  }
  func.func @transform_0(%arg0: i32) -> (i32, i32) {
    %c0_i32 = arith.constant 0 : i32
    %c0_i32_0 = arith.constant 0 : i32
    return %arg0, %c0_i32 : i32, i32
  }
  func.func @transform_1(%arg0: i32) -> (i32, i32) {
    %c0_i32 = arith.constant 0 : i32
    %c0_i32_0 = arith.constant 0 : i32
    %c0_i32_1 = arith.constant 0 : i32
    return %c0_i32, %c0_i32_0 : i32, i32
  }
  func.func @transform_2(%arg0: i32) -> (i32, i32) {
    %c0_i32 = arith.constant 0 : i32
    %c0_i32_0 = arith.constant 0 : i32
    %c0_i32_1 = arith.constant 0 : i32
    return %c0_i32, %c0_i32_0 : i32, i32
  }
  func.func @transform_3(%arg0: i32) -> (i32, i32) {
    %c0_i32 = arith.constant 0 : i32
    %c0_i32_0 = arith.constant 0 : i32
    %c0_i32_1 = arith.constant 0 : i32
    return %c0_i32, %c0_i32_0 : i32, i32
  }
  func.func @transform_4(%arg0: i32) -> (i32, i32) {
    %c0_i32 = arith.constant 0 : i32
    %c0_i32_0 = arith.constant 0 : i32
    %c0_i32_1 = arith.constant 0 : i32
    return %c0_i32, %c0_i32_0 : i32, i32
  }
  func.func @transform_5(%arg0: i32) -> (i32, i32) {
    %c0_i32 = arith.constant 0 : i32
    %c0_i32_0 = arith.constant 0 : i32
    return %arg0, %c0_i32 : i32, i32
  }
}

</mosaic_0001>

<bundles_post_ra>
// kernel: feedforward_controller_forward.1
= control target key start
LH: loop header
LB: loop body
LE: loop exit
PB: predicated region body
PF: predicated region fallthrough
CT: control target
= control target key end

     0   :  { %10 = vsyncpa [#allocation3], 0  ;;  %s478_s0 = inlined_call_operand.vmem [shape: bf16[8,128], index: 0, kind: input, shape index: {}]   ;;  %s479_s1 = inlined_call_operand.hbm [shape: bf16[128,128], index: 1, kind: input, shape index: {}]   ;;  %s480_s2 = inlined_call_operand.vmem [shape: f32[1,128], index: 2, kind: input, shape index: {}]   ;;  %s481_s3 = inlined_call_operand.hbm [shape: bf16[128,128], index: 3, kind: input, shape index: {}]   ;;  %s482_s4 = inlined_call_operand.vmem [shape: f32[1,128], index: 4, kind: input, shape index: {}]   ;;  %s483_s5 = inlined_call_operand.vmem [shape: f32[8,128], index: 5, kind: output, shape index: {}]  }
   0x1   :  { %11 = vsyncpa [#allocation5], 0  ;;  %s424_s18 = smov [#allocation2]  }
   0x2   :  { %s19_s19 = sshll.u32 %s424_s18, 4  ;;  %s20_s19 = int_to_ptr.vmem [resolvable:$true] %s19_s19 }
   0x3   :  { %s388_s20 = scalar_lea.vmem %s20_s19, 1024  ;;  %p393_p1 = scmp.lt.s32.totalorder %s20_s19, %s20_s19 }
   0x4   :  { %p389_p0 = scmp.ne.s32.totalorder %s20_s19, %s388_s20  ;;  %p394_p2 = scmp.lt.s32.totalorder %s388_s20, %s388_s20 }
   0x6   :  { %p395_p3 = por %p394_p2, %p393_p1 }
   0x8   :  { %p396_p4 = pnand %p395_p3, %p389_p0 }
   0xa   :  { %399 = shalt.err (!%p396_p4)
}
   0xb   :  { %s425_s21 = smov 64   ;;  %s426_s22 = smov 4  }
   0xc   :  { %25 = dma.hbm_to_vmem [thread:$0]  %s479_s1, 1024, %s20_s19, [#allocation3], %s425_s21, %s425_s21, %s426_s22  }
   0xd   :  { %s427_s25 = smov [#allocation4]  }
   0xe   :  { %s33_s26 = sshll.u32 %s427_s25, 4  ;;  %s34_s26 = int_to_ptr.vmem [resolvable:$true] %s33_s26 }
   0xf   :  { %s408_s27 = scalar_lea.vmem %s34_s26, 1024  ;;  %p413_p6 = scmp.lt.s32.totalorder %s34_s26, %s34_s26 }
  0x10   :  { %p409_p5 = scmp.ne.s32.totalorder %s34_s26, %s408_s27  ;;  %p414_p7 = scmp.lt.s32.totalorder %s408_s27, %s408_s27 }
  0x12   :  { %p415_p8 = por %p414_p7, %p413_p6 }
  0x14   :  { %p416_p9 = pnand %p415_p8, %p409_p5 }
  0x16   :  { %419 = shalt.err (!%p416_p9)
}
  0x17   :  { %39 = dma.hbm_to_vmem [thread:$0]  %s481_s3, 1024, %s34_s26, [#allocation5], %s425_s21, %s425_s21, %s426_s22  }
  0x18   :  { %420 = dma.done.wait [#allocation3], 1024  }
  0x19   :  { %421 = vsyncadd [#allocation3], 4294966272 }
  0x1a   :  { %422 = dma.done.wait [#allocation5], 1024  }
  0x1b   :  { %423 = vsyncadd [#allocation5], 4294966272  ;;  %v428_v0 = vmov 0.0   ;;  %vm429_vm0 = vmmov 0   ;;  %v364_v1 = vld [vmem:[#allocation2 + $0x38] sm:$0xff]   ;;  %v365_v2 = vld [vmem:[#allocation2 + $0x30] sm:$0xff]  }
  0x1c   :  { %318 = vmatprep.subr.bf16.mxu0 %v428_v0  ;;  %334 = vmatprep.mubr.msk.bf16.mxu0 %vm429_vm0, %v428_v0  ;;  %v366_v3 = vld [vmem:[#allocation2 + $0x28] sm:$0xff]   ;;  %v372_v4 = vld [vmem:[#allocation4 + $0x38] sm:$0xff]   ;;  %v367_v5 = vld [vmem:[#allocation2 + $0x20] sm:$0xff]  }
  0x1d   :  { %338 = vmatprep.subr.bf16.mxu1 %v428_v0  ;;  %354 = vmatprep.mubr.msk.bf16.mxu1 %vm429_vm0, %v428_v0  ;;  %v373_v6 = vld [vmem:[#allocation4 + $0x30] sm:$0xff]   ;;  %v368_v7 = vld [vmem:[#allocation2 + $0x18] sm:$0xff]   ;;  %v374_v8 = vld [vmem:[#allocation4 + $0x28] sm:$0xff]  }
  0x1e   :  { %319 = vmatpush3.bf16.msra.mxu0 %v364_v1  ;;  %339 = vmatpush3.bf16.msra.mxu1 %v372_v4  ;;  %v369_v9 = vld [vmem:[#allocation2 + $0x10] sm:$0xff]   ;;  %v375_v10 = vld [vmem:[#allocation4 + $0x20] sm:$0xff]   ;;  %v370_v11 = vld [vmem:[#allocation2 + $0x8] sm:$0xff]  }
  0x1f   :  { %320 = vmatprep.subr.bf16.mxu0 %v428_v0  ;;  %340 = vmatprep.subr.bf16.mxu1 %v428_v0  ;;  %v376_v12 = vld [vmem:[#allocation4 + $0x18] sm:$0xff]   ;;  %v371_v13 = vld [vmem:[#allocation2] sm:$0xff]   ;;  %v377_v14 = vld [vmem:[#allocation4 + $0x10] sm:$0xff]  }
  0x20   :  { %v49_v15 = vld [vmem:[%s478_s0] sm:$0xf]  ;;  %v378_v16 = vld [vmem:[#allocation4 + $0x8] sm:$0xff]  }
  0x21   :  { %v379_v17 = vld [vmem:[#allocation4] sm:$0xff]  }
  0x22   :  { %321 = vmatpush3.bf16.msra.mxu0 %v365_v2  ;;  %341 = vmatpush3.bf16.msra.mxu1 %v373_v6  ;;  %v282_v18 = vld [vmem:[%s480_s2] ss:$0 sm:$0xff] }
  0x23   :  { %322 = vmatprep.subr.bf16.mxu0 %v428_v0  ;;  %342 = vmatprep.subr.bf16.mxu1 %v428_v0  ;;  %v291_v26 = vld [vmem:[%s482_s4] ss:$0 sm:$0xff] }
  0x26   :  { %323 = vmatpush3.bf16.msra.mxu0 %v366_v3  ;;  %343 = vmatpush3.bf16.msra.mxu1 %v374_v8 }
  0x27   :  { %324 = vmatprep.subr.bf16.mxu0 %v428_v0  ;;  %344 = vmatprep.subr.bf16.mxu1 %v428_v0 }
  0x2a   :  { %325 = vmatpush3.bf16.msra.mxu0 %v367_v5  ;;  %345 = vmatpush3.bf16.msra.mxu1 %v375_v10 }
  0x2b   :  { %326 = vmatprep.subr.bf16.mxu0 %v428_v0  ;;  %346 = vmatprep.subr.bf16.mxu1 %v428_v0 }
  0x2e   :  { %327 = vmatpush3.bf16.msra.mxu0 %v368_v7  ;;  %347 = vmatpush3.bf16.msra.mxu1 %v376_v12 }
  0x2f   :  { %328 = vmatprep.subr.bf16.mxu0 %v428_v0  ;;  %348 = vmatprep.subr.bf16.mxu1 %v428_v0 }
  0x32   :  { %329 = vmatpush3.bf16.msra.mxu0 %v369_v9  ;;  %349 = vmatpush3.bf16.msra.mxu1 %v377_v14 }
  0x33   :  { %330 = vmatprep.subr.bf16.mxu0 %v428_v0  ;;  %350 = vmatprep.subr.bf16.mxu1 %v428_v0 }
  0x36   :  { %331 = vmatpush3.bf16.msra.mxu0 %v370_v11  ;;  %351 = vmatpush3.bf16.msra.mxu1 %v378_v16 }
  0x37   :  { %332 = vmatprep.subr.bf16.mxu0 %v428_v0  ;;  %352 = vmatprep.subr.bf16.mxu1 %v428_v0 }
  0x3a   :  { %333 = vmatpush3.bf16.msra.mxu0 %v371_v13  ;;  %353 = vmatpush3.bf16.msra.mxu1 %v379_v17 }
  0x3d   :  { %335 = vmatmul.mubr.bf16.vlgmr.msra.gmra.mxu0 %v49_v15 }
  0xfd   :  { %v155_v19 = vpop.f32.mrf.mxu0 }
  0xfe   :  { %v156_v20 = vadd.f32 %v282_v18, %v155_v19 }
  0xff   :  { %v336_v21 = vpop.f32.mrf.mxu0 }
 0x100   :  { %v161_v22 = vmax.f32 %v156_v20, 0.0 }
 0x101   :  { %v158_v23 = vpop.f32.mrf.mxu0 }
 0x102   :  { %v162_v24 = vpack.c.bf16 %v161_v22, %v161_v22 }
 0x103   :  { %v337_v25 = vpop.f32.mrf.mxu0 }
 0x104   :  { %355 = vmatmul.mubr.bf16.vlgmr.msra.gmra.mxu1 %v162_v24 }
 0x1c4   :  { %v268_v27 = vpop.f32.mrf.mxu1 }
 0x1c5   :  { %v269_v28 = vadd.f32 %v291_v26, %v268_v27 }
 0x1c6   :  { %v356_v29 = vpop.f32.mrf.mxu1 }
 0x1c7   :  { %v274_v30 = vmax.f32 %v269_v28, 0.0 }
 0x1c8   :  { %v271_v31 = vpop.f32.mrf.mxu1 }
 0x1c9   :  { %275 = vst [vmem:[%s483_s5] sm:$0xff] %v274_v30 }
 0x1ca   :  { %v357_v32 = vpop.f32.mrf.mxu1 }
 0x1cb   :  { %280 = vsyncpa [#allocation3], 1 }
 0x1cc   :  { %281 = vsyncpa [#allocation5], 1 }

</bundles_post_ra>
